<compile_context>
chip_gen: v7x
topology: tpu7x:2x2x1
jax: 0.10.0
libtpu: 0.0.40
codegen_flags: <defaults>
</compile_context>

<pallas_src>
import math
from functools import partial

import jax
import jax.numpy as jnp
from jax.experimental import pallas as pl
from jax.experimental.pallas import tpu as pltpu


# --------------------------------- kernel -----------------------------------

def _make_mlp_kernel(num_linear):
    """Kernel computing an MLP over one batch tile:
       (num_linear-1) x [Linear, ReLU] + final (zero-interleaved) Linear."""

    def kernel(*refs):
        # refs = (x_ref, w0, b0, w1, b1, ..., w_{L-1}, b_{L-1}, out_ref)
        x_ref = refs[0]
        o_ref = refs[-1]
        h = x_ref[...]                       # native dtype feeds the MXU directly
        for layer in range(num_linear):
            w_ref = refs[1 + 2 * layer]
            b_ref = refs[2 + 2 * layer]      # shape (1, out_features)
            acc = jnp.dot(h, w_ref[...], preferred_element_type=jnp.float32)
            acc = acc + b_ref[...].astype(jnp.float32)
            if layer < num_linear - 1:
                # ReLU in f32, then back to the compute dtype for the next dot.
                h = jnp.maximum(acc, 0.0).astype(x_ref.dtype)
            else:
                o_ref[...] = acc.astype(o_ref.dtype)

    return kernel


# ------------------------------ params / packing ----------------------------

def init_params(key, in_dim, out_dim, hidden_size, num_layers, dtype=jnp.float32):
    """Deterministic init mirroring the PyTorch module:
       weight ~ N(0, sqrt(2/fan_in)), bias = 0. Weights stored as (in, out)."""
    params = []
    d = in_dim
    dims = [hidden_size] * (num_layers - 1) + [out_dim]
    for h in dims:
        key, sub = jax.random.split(key)
        w = (jax.random.normal(sub, (d, h), dtype=jnp.float32)
             * math.sqrt(2.0 / d)).astype(dtype)
        b = jnp.zeros((1, h), dtype=dtype)
        params.append((w, b))
        d = h
    return params


def pack_params(params):
    """One-time transform (outside the jitted forward): interleave the final
    Linear's columns with zero columns so the kernel's (block_b, 2*out_dim)
    output tile is already the row-major (out_dim, 2) layout — even lanes are
    channel 0 (exact zeros), odd lanes are channel 1 (MLP output)."""
    w_last, b_last = params[-1]
    hidden_in, out_dim = w_last.shape
    w_pack = jnp.zeros((hidden_in, 2 * out_dim), w_last.dtype).at[:, 1::2].set(w_last)
    b_pack = jnp.zeros((1, 2 * out_dim), b_last.dtype).at[:, 1::2].set(b_last)
    return tuple(params[:-1]) + ((w_pack, b_pack),)


# ------------------------------ block picking -------------------------------

_MAX_BLOCK_B = 8192   # raised from 512: per-step overhead dominates below this


def _round_up(x, m):
    return ((x + m - 1) // m) * m


def _sublane_multiple(dtype):
    # f32 -> 8, bf16 -> 16, int8/fp8 -> 32
    return max(8, 32 // jnp.dtype(dtype).itemsize)


def _num_tensorcores():
    """TensorCores per chip on the current backend (v5e/v6e: 1, v7x: 2)."""
    try:
        kind = (jax.devices()[0].device_kind or "").lower()
    except Exception:
        return 1
    return 2 if "7" in kind else 1


def _pick_block_b(batch, dtype, num_cores):
    mult = _sublane_multiple(dtype)
    if num_cores >= 2 and batch > mult:
        # 2-TC chips: even, balanced grid so the masked tail block doesn't
        # leave one TensorCore mostly idle on the last step.
        k = 1
        while _round_up(pl.cdiv(batch, num_cores * k), mult) > _MAX_BLOCK_B:
            k += 1
        block = _round_up(pl.cdiv(batch, num_cores * k), mult)
    else:
        # Single TensorCore: one big block (fewest grid steps).
        block = min(_MAX_BLOCK_B, _round_up(batch, mult))
    return max(mult, block)


# --------------------------------- forward ----------------------------------

@partial(jax.jit, static_argnames=("block_b",))
def _forward_impl(xs, packed_params, block_b):
    B, in_dim = xs.shape
    num_linear = len(packed_params)
    packed_out = packed_params[-1][0].shape[1]      # 2 * out_dim
    out_dim = packed_out // 2

    kernel = _make_mlp_kernel(num_linear)

    flat_args = [xs]
    in_specs = [pl.BlockSpec((block_b, in_dim), lambda i: (i, 0))]
    weight_bytes = 0
    for (w, b) in packed_params:
        flat_args.append(w)
        flat_args.append(b)
        # Constant index_map: fetched once, resident across grid steps.
        in_specs.append(pl.BlockSpec(w.shape, lambda i: (0, 0)))
        in_specs.append(pl.BlockSpec(b.shape, lambda i: (0, 0)))
        weight_bytes += w.size * w.dtype.itemsize + b.size * b.dtype.itemsize

    flops = 2 * B * sum(w.shape[0] * w.shape[1] for (w, _) in packed_params)
    bytes_accessed = (xs.size * xs.dtype.itemsize
                      + B * packed_out * xs.dtype.itemsize
                      + weight_bytes)

    y = pl.pallas_call(
        kernel,
        out_shape=jax.ShapeDtypeStruct((B, packed_out), xs.dtype),
        grid_spec=pltpu.PrefetchScalarGridSpec(
            num_scalar_prefetch=0,
            grid=(pl.cdiv(B, block_b),),            # arbitrary B: masked tail
            in_specs=in_specs,
            out_specs=pl.BlockSpec((block_b, packed_out), lambda i: (i, 0)),
        ),
        compiler_params=pltpu.CompilerParams(
            dimension_semantics=("parallel",),
            vmem_limit_bytes=32 * 1024 * 1024,
        ),
        cost_estimate=pl.CostEstimate(
            flops=flops, transcendentals=0, bytes_accessed=bytes_accessed),
    )(*flat_args)

    # Free reshape: (B, 2*out_dim) row-major == (B, out_dim, 2) interleaved.
    return y.reshape(B, out_dim, 2)


def feature_energy_forward(xs, packed_params, block_b=None):
    """xs: (B, in_dim) -> (B, out_dim, 2) with channel 1 = MLP(xs), channel 0 = 0."""
    if block_b is None:
        block_b = _pick_block_b(xs.shape[0], xs.dtype, _num_tensorcores())
    return _forward_impl(xs, packed_params, block_b)


# ----------------------------------- demo -----------------------------------

if __name__ == "__main__":
    # Shapes consistent with the module's forward:
    #   xs: (batch, in_dim); cfg.num_layers=3, cfg.hidden_size=32, out_dim=16.
    # B=203 is deliberately not a sublane multiple so the pl.cdiv masked-tail
    # path is exercised even with a single big block.
    B, IN_DIM, HIDDEN, OUT_DIM, NUM_LAYERS = 203, 32, 32, 16, 3

    key = jax.random.PRNGKey(0)
    key, kx = jax.random.split(key)
    xs = jax.random.normal(kx, (B, IN_DIM), dtype=jnp.float32)
    params = init_params(key, IN_DIM, OUT_DIM, HIDDEN, NUM_LAYERS)
    packed = pack_params(params)          # one-time, outside the jitted forward

    # ---- f32 path: strict correctness check against a pure-JAX reference ----
    out = jax.block_until_ready(feature_energy_forward(xs, packed))
    assert out.shape == (B, OUT_DIM, 2), out.shape
    # channel 0 must be exactly zero (xs.new_zeros semantics).
    assert float(jnp.abs(out[:, :, 0]).max()) == 0.0

    h = xs
    for li, (w, b) in enumerate(params):
        h = h @ w + b
        if li < len(params) - 1:
            h = jnp.maximum(h, 0.0)
    assert jnp.allclose(out[:, :, 1], h, atol=1e-5, rtol=1e-5)

    # ---- bf16 hot path (review: halve HBM traffic, native MXU dtype) --------
    xs_bf16 = xs.astype(jnp.bfloat16)
    packed_bf16 = jax.tree_util.tree_map(lambda a: a.astype(jnp.bfloat16), packed)
    out_bf16 = jax.block_until_ready(feature_energy_forward(xs_bf16, packed_bf16))
    assert out_bf16.shape == (B, OUT_DIM, 2), out_bf16.shape
    assert float(jnp.abs(out_bf16[:, :, 0].astype(jnp.float32)).max()) == 0.0
    # bf16 re-quantizes activations between layers: loose tolerance vs f32 ref.
    err = float(jnp.max(jnp.abs(out_bf16[:, :, 1].astype(jnp.float32) - h)))
    assert err < 0.15 * (1.0 + float(jnp.max(jnp.abs(h)))), err

    print("KERNEL_OK")
</pallas_src>

<mosaic_0001>
module attributes {stable_mosaic.version = 11 : i64} {
  func.func @kernel(%arg0: i32, %arg1: memref<208x32xf32, #tpu.memory_space<vmem>>, %arg2: memref<32x32xf32, #tpu.memory_space<vmem>>, %arg3: memref<1x32xf32, #tpu.memory_space<vmem>>, %arg4: memref<32x32xf32, #tpu.memory_space<vmem>>, %arg5: memref<1x32xf32, #tpu.memory_space<vmem>>, %arg6: memref<32x32xf32, #tpu.memory_space<vmem>>, %arg7: memref<1x32xf32, #tpu.memory_space<vmem>>, %arg8: memref<208x32xf32, #tpu.memory_space<vmem>>) attributes {dimension_semantics = [#tpu.dimension_semantics<parallel>], iteration_bounds = array<i64: 1>, scalar_prefetch = 0 : i64, scratch_operands = 0 : i64, tpu.core_type = #tpu.core_type<tc>, window_params = [{transform_indices = @transform_0, window_bounds = array<i64: 208, 32>}, {pipeline_mode = #tpu.pipeline_mode<synchronous>, transform_indices = @transform_1, window_bounds = array<i64: 32, 32>}, {pipeline_mode = #tpu.pipeline_mode<synchronous>, transform_indices = @transform_2, window_bounds = array<i64: 1, 32>}, {pipeline_mode = #tpu.pipeline_mode<synchronous>, transform_indices = @transform_3, window_bounds = array<i64: 32, 32>}, {pipeline_mode = #tpu.pipeline_mode<synchronous>, transform_indices = @transform_4, window_bounds = array<i64: 1, 32>}, {pipeline_mode = #tpu.pipeline_mode<synchronous>, transform_indices = @transform_5, window_bounds = array<i64: 32, 32>}, {pipeline_mode = #tpu.pipeline_mode<synchronous>, transform_indices = @transform_6, window_bounds = array<i64: 1, 32>}, {transform_indices = @transform_7, window_bounds = array<i64: 208, 32>}]} {
    %c0 = arith.constant 0 : index
    %c0_0 = arith.constant 0 : index
    %0 = vector.load %arg1[%c0, %c0_0] : memref<208x32xf32, #tpu.memory_space<vmem>>, vector<208x32xf32>
    %c0_1 = arith.constant 0 : index
    %c0_2 = arith.constant 0 : index
    %1 = vector.load %arg2[%c0_1, %c0_2] : memref<32x32xf32, #tpu.memory_space<vmem>>, vector<32x32xf32>
    %cst = arith.constant dense<0.000000e+00> : vector<208x32xf32>
    %2 = tpu.matmul %0, %1, %cst {dimension_numbers = #tpu.dot_dimension_numbers<[1], [0], [0], [1], [0, 0, 1, 1], [], []>} : vector<208x32xf32>, vector<32x32xf32>, vector<208x32xf32> -> vector<208x32xf32>
    %c0_3 = arith.constant 0 : index
    %c0_4 = arith.constant 0 : index
    %3 = vector.load %arg3[%c0_3, %c0_4] : memref<1x32xf32, #tpu.memory_space<vmem>>, vector<1x32xf32>
    %4 = vector.broadcast %3 : vector<1x32xf32> to vector<208x32xf32>
    %5 = arith.addf %2, %4 : vector<208x32xf32>
    %cst_5 = arith.constant 0.000000e+00 : f32
    %6 = vector.broadcast %cst_5 : f32 to vector<208x32xf32>
    %7 = arith.maximumf %5, %6 : vector<208x32xf32>
    %c0_6 = arith.constant 0 : index
    %c0_7 = arith.constant 0 : index
    %8 = vector.load %arg4[%c0_6, %c0_7] : memref<32x32xf32, #tpu.memory_space<vmem>>, vector<32x32xf32>
    %cst_8 = arith.constant dense<0.000000e+00> : vector<208x32xf32>
    %9 = tpu.matmul %7, %8, %cst_8 {dimension_numbers = #tpu.dot_dimension_numbers<[1], [0], [0], [1], [0, 0, 1, 1], [], []>} : vector<208x32xf32>, vector<32x32xf32>, vector<208x32xf32> -> vector<208x32xf32>
    %c0_9 = arith.constant 0 : index
    %c0_10 = arith.constant 0 : index
    %10 = vector.load %arg5[%c0_9, %c0_10] : memref<1x32xf32, #tpu.memory_space<vmem>>, vector<1x32xf32>
    %11 = vector.broadcast %10 : vector<1x32xf32> to vector<208x32xf32>
    %12 = arith.addf %9, %11 : vector<208x32xf32>
    %cst_11 = arith.constant 0.000000e+00 : f32
    %13 = vector.broadcast %cst_11 : f32 to vector<208x32xf32>
    %14 = arith.maximumf %12, %13 : vector<208x32xf32>
    %c0_12 = arith.constant 0 : index
    %c0_13 = arith.constant 0 : index
    %15 = vector.load %arg6[%c0_12, %c0_13] : memref<32x32xf32, #tpu.memory_space<vmem>>, vector<32x32xf32>
    %cst_14 = arith.constant dense<0.000000e+00> : vector<208x32xf32>
    %16 = tpu.matmul %14, %15, %cst_14 {dimension_numbers = #tpu.dot_dimension_numbers<[1], [0], [0], [1], [0, 0, 1, 1], [], []>} : vector<208x32xf32>, vector<32x32xf32>, vector<208x32xf32> -> vector<208x32xf32>
    %c0_15 = arith.constant 0 : index
    %c0_16 = arith.constant 0 : index
    %17 = vector.load %arg7[%c0_15, %c0_16] : memref<1x32xf32, #tpu.memory_space<vmem>>, vector<1x32xf32>
    %18 = vector.broadcast %17 : vector<1x32xf32> to vector<208x32xf32>
    %19 = arith.addf %16, %18 : vector<208x32xf32>
    %c0_17 = arith.constant 0 : index
    %c0_18 = arith.constant 0 : index
    %20 = vector.load %arg8[%c0_17, %c0_18] : memref<208x32xf32, #tpu.memory_space<vmem>>, vector<208x32xf32>
    tpu.vector_store %arg8[%c0_17, %c0_18], %19 {strides = array<i32>} : memref<208x32xf32, #tpu.memory_space<vmem>>, vector<208x32xf32>,
    return
  }
  func.func @transform_0(%arg0: i32) -> (i32, i32) {
    %c0_i32 = arith.constant 0 : i32
    %c0_i32_0 = arith.constant 0 : i32
    return %arg0, %c0_i32 : i32, i32
  }
  func.func @transform_1(%arg0: i32) -> (i32, i32) {
    %c0_i32 = arith.constant 0 : i32
    %c0_i32_0 = arith.constant 0 : i32
    %c0_i32_1 = arith.constant 0 : i32
    return %c0_i32, %c0_i32_0 : i32, i32
  }
  func.func @transform_2(%arg0: i32) -> (i32, i32) {
    %c0_i32 = arith.constant 0 : i32
    %c0_i32_0 = arith.constant 0 : i32
    %c0_i32_1 = arith.constant 0 : i32
    return %c0_i32, %c0_i32_0 : i32, i32
  }
  func.func @transform_3(%arg0: i32) -> (i32, i32) {
    %c0_i32 = arith.constant 0 : i32
    %c0_i32_0 = arith.constant 0 : i32
    %c0_i32_1 = arith.constant 0 : i32
    return %c0_i32, %c0_i32_0 : i32, i32
  }
  func.func @transform_4(%arg0: i32) -> (i32, i32) {
    %c0_i32 = arith.constant 0 : i32
    %c0_i32_0 = arith.constant 0 : i32
    %c0_i32_1 = arith.constant 0 : i32
    return %c0_i32, %c0_i32_0 : i32, i32
  }
  func.func @transform_5(%arg0: i32) -> (i32, i32) {
    %c0_i32 = arith.constant 0 : i32
    %c0_i32_0 = arith.constant 0 : i32
    %c0_i32_1 = arith.constant 0 : i32
    return %c0_i32, %c0_i32_0 : i32, i32
  }
  func.func @transform_6(%arg0: i32) -> (i32, i32) {
    %c0_i32 = arith.constant 0 : i32
    %c0_i32_0 = arith.constant 0 : i32
    %c0_i32_1 = arith.constant 0 : i32
    return %c0_i32, %c0_i32_0 : i32, i32
  }
  func.func @transform_7(%arg0: i32) -> (i32, i32) {
    %c0_i32 = arith.constant 0 : i32
    %c0_i32_0 = arith.constant 0 : i32
    return %arg0, %c0_i32 : i32, i32
  }
}

</mosaic_0001>

<bundles_post_ra>
// kernel: _forward_impl.1
= control target key start
LH: loop header
LB: loop body
LE: loop exit
PB: predicated region body
PF: predicated region fallthrough
CT: control target
= control target key end

     0   :  { %vm63_vm0 = vcmask 261120   ;;  %s1765_s1 = inlined_call_operand.vmem [shape: f32[32,32], index: 1, kind: input, shape index: {}]   ;;  %s1766_s0 = inlined_call_operand.vmem [shape: f32[203,32], index: 0, kind: input, shape index: {}]   ;;  %s1767_s3 = inlined_call_operand.vmem [shape: f32[32,32], index: 3, kind: input, shape index: {}]   ;;  %s1768_s5 = inlined_call_operand.vmem [shape: f32[32,32], index: 5, kind: input, shape index: {}]   ;;  %s1769_s2 = inlined_call_operand.vmem [shape: f32[1,32], index: 2, kind: input, shape index: {}]   ;;  %s1770_s4 = inlined_call_operand.vmem [shape: f32[1,32], index: 4, kind: input, shape index: {}]   ;;  %s1771_s6 = inlined_call_operand.vmem [shape: f32[1,32], index: 6, kind: input, shape index: {}]   ;;  %s1772_s7 = inlined_call_operand.vmem [shape: f32[203,32], index: 7, kind: output, shape index: {}]  }
   0x1   :  { %v52_v0 = vld [vmem:[%s1765_s1] sm:$0xff]  ;;  %v53_v1 = vld [vmem:[%s1765_s1 + $0x8] sm:$0xff]  ;;  %v54_v2 = vld [vmem:[%s1765_s1 + $0x10] sm:$0xff] }
   0x2   :  { %v1299_v3 = vpack.c.bf16 %v53_v1, %v52_v0  ;;  %v55_v4 = vld [vmem:[%s1765_s1 + $0x18] sm:$0xff]  ;;  %v26_v5 = vld [vmem:[%s1766_s0] sm:$0xff]  ;;  %v40_v7 = vld [vmem:[%s1766_s0 + $0x70] sm:$0xff] }
   0x3   :  { %v1303_v6 = vpack.c.bf16 %v55_v4, %v54_v2  ;;  %1166 = vmatprep.mubr.msk.f32.mxu0 %vm63_vm0, %v26_v5  ;;  %1187 = vmatprep.mubr.msk.f32.mxu1 %vm63_vm0, %v40_v7  ;;  %v27_v8 = vld [vmem:[%s1766_s0 + $0x8] sm:$0xff]  ;;  %v41_v9 = vld [vmem:[%s1766_s0 + $0x78] sm:$0xff]  ;;  %v28_v10 = vld [vmem:[%s1766_s0 + $0x10] sm:$0xff] }
   0x4   :  { %1300 = vmatprep.subr.bf16.mxu0 %v1299_v3  ;;  %1323 = vmatprep.subr.bf16.mxu1 %v1299_v3  ;;  %v42_v11 = vld [vmem:[%s1766_s0 + $0x80] sm:$0xff]  ;;  %v364_v13 = vld [vmem:[%s1767_s3 + $0x8] sm:$0xff]  ;;  %v365_v14 = vld [vmem:[%s1767_s3 + $0x10] sm:$0xff] }
   0x5   :  { %1302 = vmatpush3.bf16.msra.mxu0 %v1299_v3  ;;  %1325 = vmatpush3.bf16.msra.mxu1 %v1299_v3  ;;  %v363_v12 = vld [vmem:[%s1767_s3] sm:$0xff]  ;;  %v366_v16 = vld [vmem:[%s1767_s3 + $0x18] sm:$0xff]  ;;  %v43_v18 = vld [vmem:[%s1766_s0 + $0x88] sm:$0xff] }
   0x6   :  { %1304 = vmatprep.subr.bf16.mxu0 %v1303_v6  ;;  %1324 = vmatprep.subr.bf16.mxu1 %v1303_v6  ;;  %v1307_v15 = vpack.c.bf16 %v364_v13, %v363_v12  ;;  %v29_v17 = vld [vmem:[%s1766_s0 + $0x18] sm:$0xff]  ;;  %v30_v19 = vld [vmem:[%s1766_s0 + $0x20] sm:$0xff]  ;;  %v44_v20 = vld [vmem:[%s1766_s0 + $0x90] sm:$0xff]  ;;  %v1311_v21 = vpack.c.bf16 %v366_v16, %v365_v14 }
   0x7   :  { %v31_v22 = vld [vmem:[%s1766_s0 + $0x28] sm:$0xff]  ;;  %v45_v23 = vld [vmem:[%s1766_s0 + $0x98] sm:$0xff]  ;;  %v32_v24 = vld [vmem:[%s1766_s0 + $0x30] sm:$0xff] }
   0x8   :  { %v46_v25 = vld [vmem:[%s1766_s0 + $0xa0] sm:$0xff]  ;;  %v33_v26 = vld [vmem:[%s1766_s0 + $0x38] sm:$0xff]  ;;  %v47_v27 = vld [vmem:[%s1766_s0 + $0xa8] sm:$0xff] }
   0x9   :  { %1306 = vmatpush3.bf16.msra.mxu0 %v1303_v6  ;;  %1326 = vmatpush3.bf16.msra.mxu1 %v1303_v6  ;;  %v34_v28 = vld [vmem:[%s1766_s0 + $0x40] sm:$0xff]  ;;  %v48_v29 = vld [vmem:[%s1766_s0 + $0xb0] sm:$0xff]  ;;  %v35_v30 = vld [vmem:[%s1766_s0 + $0x48] sm:$0xff] }
   0xa   :  { %1308 = vmatprep.subr.bf16.mxu1 %v1307_v15  ;;  %v49_v31 = vld [vmem:[%s1766_s0 + $0xb8] sm:$0xff]  ;;  %v36_v32 = vld [vmem:[%s1766_s0 + $0x50] sm:$0xff]  ;;  %v50_v33 = vld [vmem:[%s1766_s0 + $0xc0] sm:$0xff] }
   0xb   :  { %v37_v34 = vld [vmem:[%s1766_s0 + $0x58] sm:$0xff]  ;;  %v51_v35 = vld [vmem:[%s1766_s0 + $0xc8] sm:$0xff]  ;;  %v38_v36 = vld [vmem:[%s1766_s0 + $0x60] sm:$0xff] }
   0xc   :  { %1167 = vmatmul.mubr.msk.f32.vlgmr.msra.gmra.mrb[0].mxu0 %vm63_vm0, %v27_v8  ;;  %1188 = vmatmul.mubr.msk.f32.vlgmr.msra.gmra.mrb[0].mxu1 %vm63_vm0, %v41_v9  ;;  %v39_v37 = vld [vmem:[%s1766_s0 + $0x68] sm:$0xff]  ;;  %v673_v38 = vld [vmem:[%s1768_s5] sm:$0xff]  ;;  %v675_v40 = vld [vmem:[%s1768_s5 + $0x10] sm:$0xff] }
   0xd   :  { %1169 = vmatprep.mubr.msk.f32.mxu0 %vm63_vm0, %v28_v10  ;;  %1190 = vmatprep.mubr.msk.f32.mxu1 %vm63_vm0, %v42_v11  ;;  %v674_v39 = vld [vmem:[%s1768_s5 + $0x8] sm:$0xff]  ;;  %v676_v42 = vld [vmem:[%s1768_s5 + $0x18] sm:$0xff]  ;;  %v1510_v44 = vld [vmem:[%s1769_s2] ss:$0 sm:$0xff] }
   0xe   :  { %1310 = vmatpush3.bf16.msra.mxu1 %v1307_v15  ;;  %v1315_v41 = vpack.c.bf16 %v674_v39, %v673_v38  ;;  %v1319_v43 = vpack.c.bf16 %v676_v42, %v675_v40 }
   0xf   :  { %1312 = vmatprep.subr.bf16.mxu1 %v1311_v21 }
  0x10   :  { %1170 = vmatmul.mubr.msk.f32.gmra.mrb[2].mxu0 %vm63_vm0, %v29_v17  ;;  %1191 = vmatmul.mubr.msk.f32.gmra.mrb[2].mxu1 %vm63_vm0, %v43_v18 }
  0x11   :  { %1172 = vmatprep.mubr.msk.f32.mxu0 %vm63_vm0, %v30_v19  ;;  %1193 = vmatprep.mubr.msk.f32.mxu1 %vm63_vm0, %v44_v20 }
  0x12   :  { %1314 = vmatpush3.bf16.msra.mxu1 %v1311_v21  ;;  %1316 = vmatprep.subr.bf16.mxu0 %v1315_v41 }
  0x13   :  { %1318 = vmatpush3.bf16.msra.mxu0 %v1315_v41 }
  0x14   :  { %1173 = vmatmul.mubr.msk.f32.gmra.mrb[4].mxu0 %vm63_vm0, %v31_v22  ;;  %1194 = vmatmul.mubr.msk.f32.gmra.mrb[4].mxu1 %vm63_vm0, %v45_v23 }
  0x15   :  { %1175 = vmatprep.mubr.msk.f32.mxu0 %vm63_vm0, %v32_v24  ;;  %1196 = vmatprep.mubr.msk.f32.mxu1 %vm63_vm0, %v46_v25 }
  0x16   :  { %1320 = vmatprep.subr.bf16.mxu0 %v1319_v43 }
  0x17   :  { %1322 = vmatpush3.bf16.msra.mxu0 %v1319_v43 }
  0x18   :  { %1176 = vmatmul.mubr.msk.f32.gmra.mrb[6].mxu0 %vm63_vm0, %v33_v26  ;;  %1197 = vmatmul.mubr.msk.f32.gmra.mrb[6].mxu1 %vm63_vm0, %v47_v27 }
  0x19   :  { %1178 = vmatprep.mubr.msk.f32.mxu0 %vm63_vm0, %v34_v28  ;;  %1199 = vmatprep.mubr.msk.f32.mxu1 %vm63_vm0, %v48_v29 }
  0x1c   :  { %1179 = vmatmul.mubr.msk.f32.gmra.mrb[8].mxu0 %vm63_vm0, %v35_v30  ;;  %1200 = vmatmul.mubr.msk.f32.gmra.mrb[8].mxu1 %vm63_vm0, %v49_v31 }
  0x1d   :  { %1181 = vmatprep.mubr.msk.f32.mxu0 %vm63_vm0, %v36_v32  ;;  %1202 = vmatprep.mubr.msk.f32.mxu1 %vm63_vm0, %v50_v33 }
  0x20   :  { %1182 = vmatmul.mubr.msk.f32.gmra.mrb[10].mxu0 %vm63_vm0, %v37_v34  ;;  %1203 = vmatmul.mubr.msk.f32.gmra.mrb[10].mxu1 %vm63_vm0, %v51_v35 }
  0x21   :  { %1184 = vmatprep.mubr.msk.f32.mxu0 %vm63_vm0, %v38_v36 }
  0x24   :  { %1185 = vmatmul.mubr.msk.f32.gmra.mrb[12].mxu0 %vm63_vm0, %v39_v37 }
  0xdf   :  { %v1168_v45 = vpop.f32.mrb[0].mxu0  ;;  %v1512_v46 = vpop.f32.mrb[0].mxu1 }
  0xe0   :  { %v214_v47 = vadd.f32 %v1168_v45, %v1510_v44  ;;  %v208_v48 = vpop.f32.mrb[1].mxu0  ;;  %v278_v49 = vpop.f32.mrb[1].mxu1  ;;  %v284_v38 = vadd.f32 %v1512_v46, %v1510_v44 }
  0xe1   :  { %v209_v50 = vadd.f32 %v1510_v44, %v208_v48  ;;  %v279_v29 = vadd.f32 %v1510_v44, %v278_v49 }
  0xe2   :  { %v338_v54 = vmax.f32 %v214_v47, 0.0  ;;  %v352_v41 = vmax.f32 %v284_v38, 0.0 }
  0xe3   :  { %v337_v51 = vmax.f32 %v209_v50, 0.0  ;;  %v1171_v52 = vpop.f32.mrb[2].mxu0  ;;  %v1516_v53 = vpop.f32.mrb[2].mxu1  ;;  %v351_v35 = vmax.f32 %v279_v29, 0.0 }
  0xe4   :  { %v224_v55 = vadd.f32 %v1171_v52, %v1510_v44  ;;  %v218_v56 = vpop.f32.mrb[3].mxu0  ;;  %v288_v57 = vpop.f32.mrb[3].mxu1  ;;  %v294_v42 = vadd.f32 %v1516_v53, %v1510_v44 }
  0xe5   :  { %v219_v58 = vadd.f32 %v1510_v44, %v218_v56  ;;  %1213 = vmatprep.mubr.msk.f32.mxu1 %vm63_vm0, %v337_v51  ;;  %v289_v36 = vadd.f32 %v1510_v44, %v288_v57 }
  0xe6   :  { %1214 = vmatmul.mubr.msk.f32.vlgmr.msra.gmra.mrb[12].mxu1 %vm63_vm0, %v338_v54  ;;  %v340_v62 = vmax.f32 %v224_v55, 0.0  ;;  %v354_v46 = vmax.f32 %v294_v42, 0.0 }
  0xe7   :  { %v339_v59 = vmax.f32 %v219_v58, 0.0  ;;  %v1174_v60 = vpop.f32.mrb[4].mxu0  ;;  %v1522_v61 = vpop.f32.mrb[4].mxu1  ;;  %v353_v39 = vmax.f32 %v289_v36, 0.0 }
  0xe8   :  { %v234_v63 = vadd.f32 %v1174_v60, %v1510_v44  ;;  %v228_v0 = vpop.f32.mrb[5].mxu0  ;;  %v298_v1 = vpop.f32.mrb[5].mxu1  ;;  %v304_v47 = vadd.f32 %v1522_v61, %v1510_v44  ;;  %v1576_v60 = vld [vmem:[%s1770_s4] ss:$0 sm:$0xff] }
  0xe9   :  { %v229_v2 = vadd.f32 %v1510_v44, %v228_v0  ;;  %1216 = vmatprep.mubr.msk.f32.mxu1 %vm63_vm0, %v339_v59  ;;  %v299_v40 = vadd.f32 %v1510_v44, %v298_v1 }
  0xea   :  { %1217 = vmatmul.mubr.msk.f32.gmra.mrb[14].mxu1 %vm63_vm0, %v340_v62  ;;  %v342_v6 = vmax.f32 %v234_v63, 0.0  ;;  %v356_v50 = vmax.f32 %v304_v47, 0.0 }
  0xeb   :  { %v341_v3 = vmax.f32 %v229_v2, 0.0  ;;  %v1177_v4 = vpop.f32.mrb[6].mxu0  ;;  %v1198_v5 = vpop.f32.mrb[6].mxu1  ;;  %v355_v43 = vmax.f32 %v299_v40, 0.0 }
  0xec   :  { %v244_v7 = vadd.f32 %v1177_v4, %v1510_v44  ;;  %v238_v8 = vpop.f32.mrb[7].mxu0  ;;  %v308_v9 = vpop.f32.mrb[7].mxu1  ;;  %v314_v51 = vadd.f32 %v1198_v5, %v1510_v44 }
  0xed   :  { %v239_v10 = vadd.f32 %v1510_v44, %v238_v8  ;;  %1219 = vmatprep.mubr.msk.f32.mxu1 %vm63_vm0, %v341_v3  ;;  %v309_v45 = vadd.f32 %v1510_v44, %v308_v9 }
  0xee   :  { %1220 = vmatmul.mubr.msk.f32.gmra.mrb[16].mxu1 %vm63_vm0, %v342_v6  ;;  %v344_v14 = vmax.f32 %v244_v7, 0.0  ;;  %v358_v54 = vmax.f32 %v314_v51, 0.0 }
  0xef   :  { %v343_v11 = vmax.f32 %v239_v10, 0.0  ;;  %v1180_v12 = vpop.f32.mrb[8].mxu0  ;;  %v1201_v13 = vpop.f32.mrb[8].mxu1  ;;  %v357_v48 = vmax.f32 %v309_v45, 0.0 }
  0xf0   :  { %v254_v15 = vadd.f32 %v1180_v12, %v1510_v44  ;;  %v248_v16 = vpop.f32.mrb[9].mxu0  ;;  %v318_v17 = vpop.f32.mrb[9].mxu1  ;;  %v324_v55 = vadd.f32 %v1201_v13, %v1510_v44 }
  0xf1   :  { %v249_v18 = vadd.f32 %v1510_v44, %v248_v16  ;;  %1222 = vmatprep.mubr.msk.f32.mxu1 %vm63_vm0, %v343_v11  ;;  %v319_v49 = vadd.f32 %v1510_v44, %v318_v17 }
  0xf2   :  { %1223 = vmatmul.mubr.msk.f32.gmra.mrb[18].mxu1 %vm63_vm0, %v344_v14  ;;  %v346_v22 = vmax.f32 %v254_v15, 0.0  ;;  %v360_v57 = vmax.f32 %v324_v55, 0.0 }
  0xf3   :  { %v345_v19 = vmax.f32 %v249_v18, 0.0  ;;  %v1183_v20 = vpop.f32.mrb[10].mxu0  ;;  %v1204_v21 = vpop.f32.mrb[10].mxu1  ;;  %v359_v52 = vmax.f32 %v319_v49, 0.0 }
  0xf4   :  { %v264_v23 = vadd.f32 %v1183_v20, %v1510_v44  ;;  %v258_v24 = vpop.f32.mrb[11].mxu0  ;;  %v328_v25 = vpop.f32.mrb[11].mxu1  ;;  %v334_v58 = vadd.f32 %v1204_v21, %v1510_v44 }
  0xf5   :  { %v259_v26 = vadd.f32 %v1510_v44, %v258_v24  ;;  %1225 = vmatprep.mubr.msk.f32.mxu1 %vm63_vm0, %v345_v19  ;;  %v329_v53 = vadd.f32 %v1510_v44, %v328_v25 }
  0xf6   :  { %1226 = vmatmul.mubr.msk.f32.gmra.mrb[20].mxu1 %vm63_vm0, %v346_v22  ;;  %v348_v30 = vmax.f32 %v264_v23, 0.0  ;;  %v362_v59 = vmax.f32 %v334_v58, 0.0 }
  0xf7   :  { %v347_v27 = vmax.f32 %v259_v26, 0.0  ;;  %v1186_v28 = vpop.f32.mrb[12].mxu0  ;;  %v361_v56 = vmax.f32 %v329_v53, 0.0 }
  0xf8   :  { %v274_v31 = vadd.f32 %v1186_v28, %v1510_v44  ;;  %v268_v32 = vpop.f32.mrb[13].mxu0 }
  0xf9   :  { %v269_v33 = vadd.f32 %v1510_v44, %v268_v32  ;;  %1228 = vmatprep.mubr.msk.f32.mxu1 %vm63_vm0, %v347_v27 }
  0xfa   :  { %1229 = vmatmul.mubr.msk.f32.gmra.mrb[22].mxu1 %vm63_vm0, %v348_v30  ;;  %v350_v37 = vmax.f32 %v274_v31, 0.0 }
  0xfb   :  { %v349_v34 = vmax.f32 %v269_v33, 0.0 }
  0xfd   :  { %1231 = vmatprep.mubr.msk.f32.mxu1 %vm63_vm0, %v349_v34 }
  0xfe   :  { %1232 = vmatmul.mubr.msk.f32.gmra.mrb[24].mxu1 %vm63_vm0, %v350_v37 }
  0xff   :  { %1234 = vmatprep.mubr.msk.f32.mxu1 %vm63_vm0, %v351_v35 }
 0x102   :  { %1235 = vmatmul.mubr.msk.f32.gmra.mrb[26].mxu1 %vm63_vm0, %v352_v41 }
 0x103   :  { %1237 = vmatprep.mubr.msk.f32.mxu1 %vm63_vm0, %v353_v39 }
 0x106   :  { %1238 = vmatmul.mubr.msk.f32.gmra.mrb[28].mxu1 %vm63_vm0, %v354_v46 }
 0x107   :  { %1240 = vmatprep.mubr.msk.f32.mxu1 %vm63_vm0, %v355_v43 }
 0x10a   :  { %1241 = vmatmul.mubr.msk.f32.gmra.mrb[30].mxu1 %vm63_vm0, %v356_v50 }
 0x10b   :  { %1243 = vmatprep.mubr.msk.f32.mxu1 %vm63_vm0, %v357_v48 }
 0x10e   :  { %1244 = vmatmul.mubr.msk.f32.gmra.mrb[32].mxu1 %vm63_vm0, %v358_v54 }
 0x10f   :  { %1246 = vmatprep.mubr.msk.f32.mxu1 %vm63_vm0, %v359_v52 }
 0x112   :  { %1247 = vmatmul.mubr.msk.f32.gmra.mrb[34].mxu1 %vm63_vm0, %v360_v57 }
 0x113   :  { %1249 = vmatprep.mubr.msk.f32.mxu1 %vm63_vm0, %v361_v56 }
 0x116   :  { %1250 = vmatmul.mubr.msk.f32.gmra.mrb[36].mxu1 %vm63_vm0, %v362_v59 }
 0x1b9   :  { %v1215_v61 = vpop.f32.mrb[12].mxu1 }
 0x1ba   :  { %v524_v62 = vadd.f32 %v1215_v61, %v1576_v60  ;;  %v518_v63 = vpop.f32.mrb[13].mxu1 }
 0x1bb   :  { %v519_v0 = vadd.f32 %v1576_v60, %v518_v63 }
 0x1bc   :  { %v648_v2 = vmax.f32 %v524_v62, 0.0 }
 0x1bd   :  { %v647_v1 = vmax.f32 %v519_v0, 0.0  ;;  %v1218_v44 = vpop.f32.mrb[14].mxu1 }
 0x1be   :  { %v534_v3 = vadd.f32 %v1218_v44, %v1576_v60  ;;  %v528_v4 = vpop.f32.mrb[15].mxu1 }
 0x1bf   :  { %v529_v5 = vadd.f32 %v1576_v60, %v528_v4  ;;  %1260 = vmatprep.mubr.msk.f32.mxu0 %vm63_vm0, %v647_v1 }
 0x1c0   :  { %1261 = vmatmul.mubr.msk.f32.vlgmr.msra.gmra.mrb[14].mxu0 %vm63_vm0, %v648_v2  ;;  %v650_v8 = vmax.f32 %v534_v3, 0.0 }
 0x1c1   :  { %v649_v6 = vmax.f32 %v529_v5, 0.0  ;;  %v1221_v7 = vpop.f32.mrb[16].mxu1 }
 0x1c2   :  { %v544_v9 = vadd.f32 %v1221_v7, %v1576_v60  ;;  %v538_v10 = vpop.f32.mrb[17].mxu1 }
 0x1c3   :  { %v539_v11 = vadd.f32 %v1576_v60, %v538_v10  ;;  %1263 = vmatprep.mubr.msk.f32.mxu0 %vm63_vm0, %v649_v6 }
 0x1c4   :  { %1264 = vmatmul.mubr.msk.f32.gmra.mrb[16].mxu0 %vm63_vm0, %v650_v8  ;;  %v652_v14 = vmax.f32 %v544_v9, 0.0 }
 0x1c5   :  { %v651_v12 = vmax.f32 %v539_v11, 0.0  ;;  %v1224_v13 = vpop.f32.mrb[18].mxu1  ;;  %v1633_v11 = vld [vmem:[%s1771_s6] ss:$0 sm:$0xff] }
 0x1c6   :  { %v554_v15 = vadd.f32 %v1224_v13, %v1576_v60  ;;  %v548_v16 = vpop.f32.mrb[19].mxu1 }
 0x1c7   :  { %v549_v17 = vadd.f32 %v1576_v60, %v548_v16  ;;  %1266 = vmatprep.mubr.msk.f32.mxu0 %vm63_vm0, %v651_v12 }
 0x1c8   :  { %1267 = vmatmul.mubr.msk.f32.gmra.mrb[18].mxu0 %vm63_vm0, %v652_v14  ;;  %v654_v20 = vmax.f32 %v554_v15, 0.0 }
 0x1c9   :  { %v653_v18 = vmax.f32 %v549_v17, 0.0  ;;  %v1227_v19 = vpop.f32.mrb[20].mxu1 }
 0x1ca   :  { %v564_v21 = vadd.f32 %v1227_v19, %v1576_v60  ;;  %v558_v22 = vpop.f32.mrb[21].mxu1 }
 0x1cb   :  { %v559_v23 = vadd.f32 %v1576_v60, %v558_v22  ;;  %1269 = vmatprep.mubr.msk.f32.mxu0 %vm63_vm0, %v653_v18 }
 0x1cc   :  { %1270 = vmatmul.mubr.msk.f32.gmra.mrb[20].mxu0 %vm63_vm0, %v654_v20  ;;  %v656_v26 = vmax.f32 %v564_v21, 0.0 }
 0x1cd   :  { %v655_v24 = vmax.f32 %v559_v23, 0.0  ;;  %v1230_v25 = vpop.f32.mrb[22].mxu1 }
 0x1ce   :  { %v574_v27 = vadd.f32 %v1230_v25, %v1576_v60  ;;  %v568_v28 = vpop.f32.mrb[23].mxu1 }
 0x1cf   :  { %v569_v29 = vadd.f32 %v1576_v60, %v568_v28  ;;  %1272 = vmatprep.mubr.msk.f32.mxu0 %vm63_vm0, %v655_v24 }
 0x1d0   :  { %1273 = vmatmul.mubr.msk.f32.gmra.mrb[22].mxu0 %vm63_vm0, %v656_v26  ;;  %v658_v32 = vmax.f32 %v574_v27, 0.0 }
 0x1d1   :  { %v657_v30 = vmax.f32 %v569_v29, 0.0  ;;  %v1233_v31 = vpop.f32.mrb[24].mxu1 }
 0x1d2   :  { %v584_v33 = vadd.f32 %v1233_v31, %v1576_v60  ;;  %v578_v34 = vpop.f32.mrb[25].mxu1 }
 0x1d3   :  { %v579_v35 = vadd.f32 %v1576_v60, %v578_v34  ;;  %1275 = vmatprep.mubr.msk.f32.mxu0 %vm63_vm0, %v657_v30 }
 0x1d4   :  { %1276 = vmatmul.mubr.msk.f32.gmra.mrb[24].mxu0 %vm63_vm0, %v658_v32  ;;  %v660_v38 = vmax.f32 %v584_v33, 0.0 }
 0x1d5   :  { %v659_v36 = vmax.f32 %v579_v35, 0.0  ;;  %v1236_v37 = vpop.f32.mrb[26].mxu1 }
 0x1d6   :  { %v594_v39 = vadd.f32 %v1236_v37, %v1576_v60  ;;  %v588_v40 = vpop.f32.mrb[27].mxu1 }
 0x1d7   :  { %v589_v41 = vadd.f32 %v1576_v60, %v588_v40  ;;  %1278 = vmatprep.mubr.msk.f32.mxu0 %vm63_vm0, %v659_v36 }
 0x1d8   :  { %1279 = vmatmul.mubr.msk.f32.gmra.mrb[26].mxu0 %vm63_vm0, %v660_v38  ;;  %v662_v45 = vmax.f32 %v594_v39, 0.0 }
 0x1d9   :  { %v661_v42 = vmax.f32 %v589_v41, 0.0  ;;  %v1239_v43 = vpop.f32.mrb[28].mxu1 }
 0x1da   :  { %v604_v46 = vadd.f32 %v1239_v43, %v1576_v60  ;;  %v598_v47 = vpop.f32.mrb[29].mxu1 }
 0x1db   :  { %v599_v48 = vadd.f32 %v1576_v60, %v598_v47  ;;  %1281 = vmatprep.mubr.msk.f32.mxu0 %vm63_vm0, %v661_v42 }
 0x1dc   :  { %1282 = vmatmul.mubr.msk.f32.gmra.mrb[28].mxu0 %vm63_vm0, %v662_v45  ;;  %v664_v51 = vmax.f32 %v604_v46, 0.0 }
 0x1dd   :  { %v663_v49 = vmax.f32 %v599_v48, 0.0  ;;  %v1242_v50 = vpop.f32.mrb[30].mxu1 }
 0x1de   :  { %v614_v52 = vadd.f32 %v1242_v50, %v1576_v60  ;;  %v608_v53 = vpop.f32.mrb[31].mxu1 }
 0x1df   :  { %v609_v54 = vadd.f32 %v1576_v60, %v608_v53  ;;  %1284 = vmatprep.mubr.msk.f32.mxu0 %vm63_vm0, %v663_v49 }
 0x1e0   :  { %1285 = vmatmul.mubr.msk.f32.gmra.mrb[30].mxu0 %vm63_vm0, %v664_v51  ;;  %v666_v57 = vmax.f32 %v614_v52, 0.0 }
 0x1e1   :  { %v665_v55 = vmax.f32 %v609_v54, 0.0  ;;  %v1245_v56 = vpop.f32.mrb[32].mxu1 }
 0x1e2   :  { %v624_v58 = vadd.f32 %v1245_v56, %v1576_v60  ;;  %v618_v59 = vpop.f32.mrb[33].mxu1 }
 0x1e3   :  { %v619_v61 = vadd.f32 %v1576_v60, %v618_v59  ;;  %1287 = vmatprep.mubr.msk.f32.mxu0 %vm63_vm0, %v665_v55 }
 0x1e4   :  { %1288 = vmatmul.mubr.msk.f32.gmra.mrb[32].mxu0 %vm63_vm0, %v666_v57  ;;  %v668_v0 = vmax.f32 %v624_v58, 0.0 }
 0x1e5   :  { %v667_v62 = vmax.f32 %v619_v61, 0.0  ;;  %v1248_v63 = vpop.f32.mrb[34].mxu1 }
 0x1e6   :  { %v634_v1 = vadd.f32 %v1248_v63, %v1576_v60  ;;  %v628_v44 = vpop.f32.mrb[35].mxu1 }
 0x1e7   :  { %v629_v2 = vadd.f32 %v1576_v60, %v628_v44  ;;  %1290 = vmatprep.mubr.msk.f32.mxu0 %vm63_vm0, %v667_v62 }
 0x1e8   :  { %1291 = vmatmul.mubr.msk.f32.gmra.mrb[34].mxu0 %vm63_vm0, %v668_v0  ;;  %v670_v5 = vmax.f32 %v634_v1, 0.0 }
 0x1e9   :  { %v669_v3 = vmax.f32 %v629_v2, 0.0  ;;  %v1251_v4 = vpop.f32.mrb[36].mxu1 }
 0x1ea   :  { %v644_v6 = vadd.f32 %v1251_v4, %v1576_v60  ;;  %v638_v7 = vpop.f32.mrb[37].mxu1 }
 0x1eb   :  { %v639_v8 = vadd.f32 %v1576_v60, %v638_v7  ;;  %1293 = vmatprep.mubr.msk.f32.mxu0 %vm63_vm0, %v669_v3 }
 0x1ec   :  { %1294 = vmatmul.mubr.msk.f32.gmra.mrb[36].mxu0 %vm63_vm0, %v670_v5  ;;  %v672_v10 = vmax.f32 %v644_v6, 0.0 }
 0x1ed   :  { %v671_v9 = vmax.f32 %v639_v8, 0.0 }
 0x1ef   :  { %1296 = vmatprep.mubr.msk.f32.mxu0 %vm63_vm0, %v671_v9 }
 0x1f0   :  { %1297 = vmatmul.mubr.msk.f32.gmra.mrb[38].mxu0 %vm63_vm0, %v672_v10 }
 0x293   :  { %v1262_v12 = vpop.f32.mrb[14].mxu0 }
 0x294   :  { %v834_v13 = vadd.f32 %v1262_v12, %v1633_v11  ;;  %v828_v14 = vpop.f32.mrb[15].mxu0 }
 0x295   :  { %v829_v60 = vadd.f32 %v1633_v11, %v828_v14 }
 0x296   :  { %958 = vst.msk [vmem:[%s1772_s7 + $0x8] sm:$0xff] %vm63_vm0, %v834_v13 }
 0x297   :  { %957 = vst.msk [vmem:[%s1772_s7] sm:$0xff] %vm63_vm0, %v829_v60  ;;  %v1265_v15 = vpop.f32.mrb[16].mxu0 }
 0x298   :  { %v844_v16 = vadd.f32 %v1265_v15, %v1633_v11  ;;  %v838_v17 = vpop.f32.mrb[17].mxu0 }
 0x299   :  { %v839_v18 = vadd.f32 %v1633_v11, %v838_v17 }
 0x29a   :  { %960 = vst.msk [vmem:[%s1772_s7 + $0x18] sm:$0xff] %vm63_vm0, %v844_v16 }
 0x29b   :  { %959 = vst.msk [vmem:[%s1772_s7 + $0x10] sm:$0xff] %vm63_vm0, %v839_v18  ;;  %v1268_v19 = vpop.f32.mrb[18].mxu0 }
 0x29c   :  { %v854_v20 = vadd.f32 %v1268_v19, %v1633_v11  ;;  %v848_v21 = vpop.f32.mrb[19].mxu0 }
 0x29d   :  { %v849_v22 = vadd.f32 %v1633_v11, %v848_v21 }
 0x29e   :  { %962 = vst.msk [vmem:[%s1772_s7 + $0x28] sm:$0xff] %vm63_vm0, %v854_v20 }
 0x29f   :  { %961 = vst.msk [vmem:[%s1772_s7 + $0x20] sm:$0xff] %vm63_vm0, %v849_v22  ;;  %v1271_v23 = vpop.f32.mrb[20].mxu0 }
 0x2a0   :  { %v864_v24 = vadd.f32 %v1271_v23, %v1633_v11  ;;  %v858_v25 = vpop.f32.mrb[21].mxu0 }
 0x2a1   :  { %v859_v26 = vadd.f32 %v1633_v11, %v858_v25 }
 0x2a2   :  { %964 = vst.msk [vmem:[%s1772_s7 + $0x38] sm:$0xff] %vm63_vm0, %v864_v24 }
 0x2a3   :  { %963 = vst.msk [vmem:[%s1772_s7 + $0x30] sm:$0xff] %vm63_vm0, %v859_v26  ;;  %v1274_v27 = vpop.f32.mrb[22].mxu0 }
 0x2a4   :  { %v874_v28 = vadd.f32 %v1274_v27, %v1633_v11  ;;  %v868_v29 = vpop.f32.mrb[23].mxu0 }
 0x2a5   :  { %v869_v30 = vadd.f32 %v1633_v11, %v868_v29 }
 0x2a6   :  { %966 = vst.msk [vmem:[%s1772_s7 + $0x48] sm:$0xff] %vm63_vm0, %v874_v28 }
 0x2a7   :  { %965 = vst.msk [vmem:[%s1772_s7 + $0x40] sm:$0xff] %vm63_vm0, %v869_v30  ;;  %v1277_v31 = vpop.f32.mrb[24].mxu0 }
 0x2a8   :  { %v884_v32 = vadd.f32 %v1277_v31, %v1633_v11  ;;  %v878_v33 = vpop.f32.mrb[25].mxu0 }
 0x2a9   :  { %v879_v34 = vadd.f32 %v1633_v11, %v878_v33 }
 0x2aa   :  { %968 = vst.msk [vmem:[%s1772_s7 + $0x58] sm:$0xff] %vm63_vm0, %v884_v32 }
 0x2ab   :  { %967 = vst.msk [vmem:[%s1772_s7 + $0x50] sm:$0xff] %vm63_vm0, %v879_v34  ;;  %v1280_v35 = vpop.f32.mrb[26].mxu0 }
 0x2ac   :  { %v894_v36 = vadd.f32 %v1280_v35, %v1633_v11  ;;  %v888_v37 = vpop.f32.mrb[27].mxu0 }
 0x2ad   :  { %v889_v38 = vadd.f32 %v1633_v11, %v888_v37 }
 0x2ae   :  { %970 = vst.msk [vmem:[%s1772_s7 + $0x68] sm:$0xff] %vm63_vm0, %v894_v36 }
 0x2af   :  { %969 = vst.msk [vmem:[%s1772_s7 + $0x60] sm:$0xff] %vm63_vm0, %v889_v38  ;;  %v1283_v39 = vpop.f32.mrb[28].mxu0 }
 0x2b0   :  { %v904_v40 = vadd.f32 %v1283_v39, %v1633_v11  ;;  %v898_v41 = vpop.f32.mrb[29].mxu0 }
 0x2b1   :  { %v899_v42 = vadd.f32 %v1633_v11, %v898_v41 }
 0x2b2   :  { %972 = vst.msk [vmem:[%s1772_s7 + $0x78] sm:$0xff] %vm63_vm0, %v904_v40 }
 0x2b3   :  { %971 = vst.msk [vmem:[%s1772_s7 + $0x70] sm:$0xff] %vm63_vm0, %v899_v42  ;;  %v1286_v43 = vpop.f32.mrb[30].mxu0 }
 0x2b4   :  { %v914_v45 = vadd.f32 %v1286_v43, %v1633_v11  ;;  %v908_v46 = vpop.f32.mrb[31].mxu0 }
 0x2b5   :  { %v909_v47 = vadd.f32 %v1633_v11, %v908_v46 }
 0x2b6   :  { %974 = vst.msk [vmem:[%s1772_s7 + $0x88] sm:$0xff] %vm63_vm0, %v914_v45 }
 0x2b7   :  { %973 = vst.msk [vmem:[%s1772_s7 + $0x80] sm:$0xff] %vm63_vm0, %v909_v47  ;;  %v1289_v48 = vpop.f32.mrb[32].mxu0 }
 0x2b8   :  { %v924_v49 = vadd.f32 %v1289_v48, %v1633_v11  ;;  %v918_v50 = vpop.f32.mrb[33].mxu0 }
 0x2b9   :  { %v919_v51 = vadd.f32 %v1633_v11, %v918_v50 }
 0x2ba   :  { %976 = vst.msk [vmem:[%s1772_s7 + $0x98] sm:$0xff] %vm63_vm0, %v924_v49 }
 0x2bb   :  { %975 = vst.msk [vmem:[%s1772_s7 + $0x90] sm:$0xff] %vm63_vm0, %v919_v51  ;;  %v1292_v52 = vpop.f32.mrb[34].mxu0 }
 0x2bc   :  { %v934_v53 = vadd.f32 %v1292_v52, %v1633_v11  ;;  %v928_v54 = vpop.f32.mrb[35].mxu0 }
 0x2bd   :  { %v929_v55 = vadd.f32 %v1633_v11, %v928_v54 }
 0x2be   :  { %978 = vst.msk [vmem:[%s1772_s7 + $0xa8] sm:$0xff] %vm63_vm0, %v934_v53 }
 0x2bf   :  { %977 = vst.msk [vmem:[%s1772_s7 + $0xa0] sm:$0xff] %vm63_vm0, %v929_v55  ;;  %v1295_v56 = vpop.f32.mrb[36].mxu0 }
 0x2c0   :  { %v944_v57 = vadd.f32 %v1295_v56, %v1633_v11  ;;  %v938_v58 = vpop.f32.mrb[37].mxu0 }
 0x2c1   :  { %v939_v59 = vadd.f32 %v1633_v11, %v938_v58 }
 0x2c2   :  { %980 = vst.msk [vmem:[%s1772_s7 + $0xb8] sm:$0xff] %vm63_vm0, %v944_v57 }
 0x2c3   :  { %979 = vst.msk [vmem:[%s1772_s7 + $0xb0] sm:$0xff] %vm63_vm0, %v939_v59  ;;  %v1298_v61 = vpop.f32.mrb[38].mxu0 }
 0x2c4   :  { %v954_v62 = vadd.f32 %v1298_v61, %v1633_v11  ;;  %v948_v63 = vpop.f32.mrb[39].mxu0 }
 0x2c5   :  { %v949_v0 = vadd.f32 %v1633_v11, %v948_v63 }
 0x2c6   :  { %982 = vst.msk [vmem:[%s1772_s7 + $0xc8] sm:$0xff] %vm63_vm0, %v954_v62 }
 0x2c7   :  { %981 = vst.msk [vmem:[%s1772_s7 + $0xc0] sm:$0xff] %vm63_vm0, %v949_v0 }

</bundles_post_ra>
